<compile_context>
chip_gen: v6e
topology: v6e:2x2x1
jax: 0.10.0
libtpu: 0.0.40
codegen_flags: <defaults>
</compile_context>

<pallas_src>
import functools

import jax
import jax.numpy as jnp
from jax.experimental import pallas as pl
from jax.experimental.pallas import tpu as pltpu


def dqn_kernel(x_ref, w1_ref, b1_ref, w2_ref, b2_ref, w3_ref, b3_ref, o_ref):
    # fc1 + ReLU  (bf16 operands, f32 accumulation / elementwise)
    h1 = jnp.dot(x_ref[...], w1_ref[...], preferred_element_type=jnp.float32)
    h1 = jnp.maximum(h1 + b1_ref[...], 0.0)
    # dropout1: identity (eval mode)

    # fc2 + ReLU
    h2 = jnp.dot(h1.astype(jnp.bfloat16), w2_ref[...],
                 preferred_element_type=jnp.float32)
    h2 = jnp.maximum(h2 + b2_ref[...], 0.0)
    # dropout2: identity (eval mode)

    # fc3 (no activation), lane-dense (padded) output store
    out = jnp.dot(h2.astype(jnp.bfloat16), w3_ref[...],
                  preferred_element_type=jnp.float32)
    o_ref[...] = (out + b3_ref[...]).astype(o_ref.dtype)


def dqn_forward(x, params, *, tile_b=512):
    """x: (B, input_dim) f32. params: dict of w1,b1,w2,b2,w3,b3 (f32,
    weights stored (in, out) i.e. transposed vs. PyTorch)."""
    w1, b1 = params["w1"], params["b1"]
    w2, b2 = params["w2"], params["b2"]
    w3, b3 = params["w3"], params["b3"]

    B, in_dim = x.shape
    hidden = w1.shape[1]
    out_dim = w3.shape[1]

    # --- lane-dense output: pad the last layer to a multiple of 128 lanes ---
    out_pad = 128 * pl.cdiv(out_dim, 128)
    w3p = jnp.zeros((hidden, out_pad), jnp.float32).at[:, :out_dim].set(w3)
    b3p = jnp.zeros((1, out_pad), jnp.float32).at[:, :out_dim].set(b3)

    # --- batch tiling: multiple of 8 sublanes, cap at tile_b rows ----------
    tb = min(tile_b, ((B + 7) // 8) * 8)
    tb = max(8, (tb // 8) * 8)
    padded_b = tb * pl.cdiv(B, tb)
    if padded_b != B:
        x = jnp.pad(x, ((0, padded_b - B), (0, 0)))

    # bf16 matmul operands (f32 accumulation kept inside the kernel).
    x_bf = x.astype(jnp.bfloat16)
    w1_bf = w1.astype(jnp.bfloat16)
    w2_bf = w2.astype(jnp.bfloat16)
    w3_bf = w3p.astype(jnp.bfloat16)

    grid = (padded_b // tb,)

    # Weights/biases: constant index_map -> resident in VMEM for all steps.
    pinned = lambda shape: pl.BlockSpec(shape, lambda i: (0, 0))

    flops = 2 * padded_b * (in_dim * hidden + hidden * hidden + hidden * out_pad)
    bytes_accessed = (
        x_bf.size * 2
        + (w1_bf.size + w2_bf.size + w3_bf.size) * 2
        + (b1.size + b2.size + b3p.size) * 4
        + padded_b * out_pad * 4
    )

    out_padded = pl.pallas_call(
        dqn_kernel,
        out_shape=jax.ShapeDtypeStruct((padded_b, out_pad), jnp.float32),
        grid=grid,
        in_specs=[
            pl.BlockSpec((tb, in_dim), lambda i: (i, 0)),      # x (streamed)
            pinned((in_dim, hidden)),                          # w1
            pinned((1, hidden)),                               # b1
            pinned((hidden, hidden)),                          # w2
            pinned((1, hidden)),                               # b2
            pinned((hidden, out_pad)),                         # w3 (padded)
            pinned((1, out_pad)),                              # b3 (padded)
        ],
        out_specs=pl.BlockSpec((tb, out_pad), lambda i: (i, 0)),
        compiler_params=pltpu.CompilerParams(
            dimension_semantics=("parallel",)),
        cost_estimate=pl.CostEstimate(
            flops=flops, transcendentals=0, bytes_accessed=bytes_accessed),
    )(x_bf, w1_bf, b1, w2_bf, b2, w3_bf, b3p)

    return out_padded[:B, :out_dim]


def init_params(key, input_dim, output_dim, hidden=128):
    """Deterministic init mimicking nn.Linear default (uniform +/- 1/sqrt(fan_in))."""
    ks = jax.random.split(key, 6)

    def linear(kw, kb, fan_in, fan_out):
        bound = 1.0 / jnp.sqrt(fan_in)
        w = jax.random.uniform(kw, (fan_in, fan_out), jnp.float32, -bound, bound)
        b = jax.random.uniform(kb, (1, fan_out), jnp.float32, -bound, bound)
        return w, b

    w1, b1 = linear(ks[0], ks[1], input_dim, hidden)
    w2, b2 = linear(ks[2], ks[3], hidden, hidden)
    w3, b3 = linear(ks[4], ks[5], hidden, output_dim)
    return {"w1": w1, "b1": b1, "w2": w2, "b2": b2, "w3": w3, "b3": b3}


def _reference(x, params):
    # Plain-JAX reference with the same bf16-operand / f32-accumulate recipe.
    w1b = params["w1"].astype(jnp.bfloat16)
    w2b = params["w2"].astype(jnp.bfloat16)
    w3b = params["w3"].astype(jnp.bfloat16)
    h = jnp.dot(x.astype(jnp.bfloat16), w1b, preferred_element_type=jnp.float32)
    h = jnp.maximum(h + params["b1"], 0.0)
    h = jnp.dot(h.astype(jnp.bfloat16), w2b, preferred_element_type=jnp.float32)
    h = jnp.maximum(h + params["b2"], 0.0)
    h = jnp.dot(h.astype(jnp.bfloat16), w3b, preferred_element_type=jnp.float32)
    return h + params["b3"]


if __name__ == "__main__":
    key = jax.random.PRNGKey(0)
    k_x1, k_x2, k_p = jax.random.split(key, 3)

    input_dim, output_dim = 32, 8
    params = init_params(k_p, input_dim, output_dim)

    # Small example (single grid step).
    x_small = jax.random.normal(k_x1, (8, input_dim), jnp.float32)
    out_small = jax.block_until_ready(dqn_forward(x_small, params))
    ref_small = _reference(x_small, params)
    assert out_small.shape == (8, output_dim)
    assert jnp.allclose(out_small, ref_small, atol=2e-2, rtol=2e-2), \
        "small-batch mismatch vs reference"

    # Larger, non-multiple batch to exercise batch tiling + padding + grid.
    x_big = jax.random.normal(k_x2, (300, input_dim), jnp.float32)
    out_big = jax.block_until_ready(dqn_forward(x_big, params, tile_b=128))
    ref_big = _reference(x_big, params)
    assert out_big.shape == (300, output_dim)
    assert jnp.allclose(out_big, ref_big, atol=2e-2, rtol=2e-2), \
        "large-batch mismatch vs reference"

    print("KERNEL_OK")
</pallas_src>

<mosaic_0001>
module attributes {stable_mosaic.version = 11 : i64} {
  func.func @dqn_kernel(%arg0: i32, %arg1: memref<8x32xbf16, #tpu.memory_space<vmem>>, %arg2: memref<32x128xbf16, #tpu.memory_space<vmem>>, %arg3: memref<1x128xf32, #tpu.memory_space<vmem>>, %arg4: memref<128x128xbf16, #tpu.memory_space<vmem>>, %arg5: memref<1x128xf32, #tpu.memory_space<vmem>>, %arg6: memref<128x128xbf16, #tpu.memory_space<vmem>>, %arg7: memref<1x128xf32, #tpu.memory_space<vmem>>, %arg8: memref<8x128xf32, #tpu.memory_space<vmem>>) attributes {dimension_semantics = [#tpu.dimension_semantics<parallel>], iteration_bounds = array<i64: 1>, scalar_prefetch = 0 : i64, scratch_operands = 0 : i64, tpu.core_type = #tpu.core_type<tc>, window_params = [{transform_indices = @transform_0, window_bounds = array<i64: 8, 32>}, {pipeline_mode = #tpu.pipeline_mode<synchronous>, transform_indices = @transform_1, window_bounds = array<i64: 32, 128>}, {pipeline_mode = #tpu.pipeline_mode<synchronous>, transform_indices = @transform_2, window_bounds = array<i64: 1, 128>}, {pipeline_mode = #tpu.pipeline_mode<synchronous>, transform_indices = @transform_3, window_bounds = array<i64: 128, 128>}, {pipeline_mode = #tpu.pipeline_mode<synchronous>, transform_indices = @transform_4, window_bounds = array<i64: 1, 128>}, {pipeline_mode = #tpu.pipeline_mode<synchronous>, transform_indices = @transform_5, window_bounds = array<i64: 128, 128>}, {pipeline_mode = #tpu.pipeline_mode<synchronous>, transform_indices = @transform_6, window_bounds = array<i64: 1, 128>}, {transform_indices = @transform_7, window_bounds = array<i64: 8, 128>}]} {
    %c0 = arith.constant 0 : index
    %c0_0 = arith.constant 0 : index
    %0 = vector.load %arg1[%c0, %c0_0] : memref<8x32xbf16, #tpu.memory_space<vmem>>, vector<8x32xbf16>
    %c0_1 = arith.constant 0 : index
    %c0_2 = arith.constant 0 : index
    %1 = vector.load %arg2[%c0_1, %c0_2] : memref<32x128xbf16, #tpu.memory_space<vmem>>, vector<32x128xbf16>
    %cst = arith.constant dense<0.000000e+00> : vector<8x128xf32>
    %2 = tpu.matmul %0, %1, %cst {dimension_numbers = #tpu.dot_dimension_numbers<[1], [0], [0], [1], [0, 0, 1, 1], [], []>} : vector<8x32xbf16>, vector<32x128xbf16>, vector<8x128xf32> -> vector<8x128xf32>
    %c0_3 = arith.constant 0 : index
    %c0_4 = arith.constant 0 : index
    %3 = vector.load %arg3[%c0_3, %c0_4] : memref<1x128xf32, #tpu.memory_space<vmem>>, vector<1x128xf32>
    %4 = vector.broadcast %3 : vector<1x128xf32> to vector<8x128xf32>
    %5 = arith.addf %2, %4 : vector<8x128xf32>
    %cst_5 = arith.constant 0.000000e+00 : f32
    %6 = vector.broadcast %cst_5 : f32 to vector<8x128xf32>
    %7 = arith.maximumf %5, %6 : vector<8x128xf32>
    %8 = arith.truncf %7 : vector<8x128xf32> to vector<8x128xbf16>
    %c0_6 = arith.constant 0 : index
    %c0_7 = arith.constant 0 : index
    %9 = vector.load %arg4[%c0_6, %c0_7] : memref<128x128xbf16, #tpu.memory_space<vmem>>, vector<128x128xbf16>
    %cst_8 = arith.constant dense<0.000000e+00> : vector<8x128xf32>
    %10 = tpu.matmul %8, %9, %cst_8 {dimension_numbers = #tpu.dot_dimension_numbers<[1], [0], [0], [1], [0, 0, 1, 1], [], []>} : vector<8x128xbf16>, vector<128x128xbf16>, vector<8x128xf32> -> vector<8x128xf32>
    %c0_9 = arith.constant 0 : index
    %c0_10 = arith.constant 0 : index
    %11 = vector.load %arg5[%c0_9, %c0_10] : memref<1x128xf32, #tpu.memory_space<vmem>>, vector<1x128xf32>
    %12 = vector.broadcast %11 : vector<1x128xf32> to vector<8x128xf32>
    %13 = arith.addf %10, %12 : vector<8x128xf32>
    %cst_11 = arith.constant 0.000000e+00 : f32
    %14 = vector.broadcast %cst_11 : f32 to vector<8x128xf32>
    %15 = arith.maximumf %13, %14 : vector<8x128xf32>
    %16 = arith.truncf %15 : vector<8x128xf32> to vector<8x128xbf16>
    %c0_12 = arith.constant 0 : index
    %c0_13 = arith.constant 0 : index
    %17 = vector.load %arg6[%c0_12, %c0_13] : memref<128x128xbf16, #tpu.memory_space<vmem>>, vector<128x128xbf16>
    %cst_14 = arith.constant dense<0.000000e+00> : vector<8x128xf32>
    %18 = tpu.matmul %16, %17, %cst_14 {dimension_numbers = #tpu.dot_dimension_numbers<[1], [0], [0], [1], [0, 0, 1, 1], [], []>} : vector<8x128xbf16>, vector<128x128xbf16>, vector<8x128xf32> -> vector<8x128xf32>
    %c0_15 = arith.constant 0 : index
    %c0_16 = arith.constant 0 : index
    %19 = vector.load %arg7[%c0_15, %c0_16] : memref<1x128xf32, #tpu.memory_space<vmem>>, vector<1x128xf32>
    %20 = vector.broadcast %19 : vector<1x128xf32> to vector<8x128xf32>
    %21 = arith.addf %18, %20 : vector<8x128xf32>
    %c0_17 = arith.constant 0 : index
    %c0_18 = arith.constant 0 : index
    %22 = vector.load %arg8[%c0_17, %c0_18] : memref<8x128xf32, #tpu.memory_space<vmem>>, vector<8x128xf32>
    tpu.vector_store %arg8[%c0_17, %c0_18], %21 {strides = array<i32>} : memref<8x128xf32, #tpu.memory_space<vmem>>, vector<8x128xf32>,
    return
  }
  func.func @transform_0(%arg0: i32) -> (i32, i32) {
    %c0_i32 = arith.constant 0 : i32
    %c0_i32_0 = arith.constant 0 : i32
    return %arg0, %c0_i32 : i32, i32
  }
  func.func @transform_1(%arg0: i32) -> (i32, i32) {
    %c0_i32 = arith.constant 0 : i32
    %c0_i32_0 = arith.constant 0 : i32
    %c0_i32_1 = arith.constant 0 : i32
    return %c0_i32, %c0_i32_0 : i32, i32
  }
  func.func @transform_2(%arg0: i32) -> (i32, i32) {
    %c0_i32 = arith.constant 0 : i32
    %c0_i32_0 = arith.constant 0 : i32
    %c0_i32_1 = arith.constant 0 : i32
    return %c0_i32, %c0_i32_0 : i32, i32
  }
  func.func @transform_3(%arg0: i32) -> (i32, i32) {
    %c0_i32 = arith.constant 0 : i32
    %c0_i32_0 = arith.constant 0 : i32
    %c0_i32_1 = arith.constant 0 : i32
    return %c0_i32, %c0_i32_0 : i32, i32
  }
  func.func @transform_4(%arg0: i32) -> (i32, i32) {
    %c0_i32 = arith.constant 0 : i32
    %c0_i32_0 = arith.constant 0 : i32
    %c0_i32_1 = arith.constant 0 : i32
    return %c0_i32, %c0_i32_0 : i32, i32
  }
  func.func @transform_5(%arg0: i32) -> (i32, i32) {
    %c0_i32 = arith.constant 0 : i32
    %c0_i32_0 = arith.constant 0 : i32
    %c0_i32_1 = arith.constant 0 : i32
    return %c0_i32, %c0_i32_0 : i32, i32
  }
  func.func @transform_6(%arg0: i32) -> (i32, i32) {
    %c0_i32 = arith.constant 0 : i32
    %c0_i32_0 = arith.constant 0 : i32
    %c0_i32_1 = arith.constant 0 : i32
    return %c0_i32, %c0_i32_0 : i32, i32
  }
  func.func @transform_7(%arg0: i32) -> (i32, i32) {
    %c0_i32 = arith.constant 0 : i32
    %c0_i32_0 = arith.constant 0 : i32
    return %arg0, %c0_i32 : i32, i32
  }
}

</mosaic_0001>

<bundles_post_ra>
// kernel: tpu_custom_call.1
= control target key start
LH: loop header
LB: loop body
LE: loop exit
PB: predicated region body
PF: predicated region fallthrough
CT: control target
= control target key end

     0   :  { %12 = vsyncpa [#allocation3], 0  ;;  %s725_s0 = inlined_call_operand.hbm [shape: bf16[8,32], index: 0, kind: input, shape index: {}]   ;;  %s726_s1 = inlined_call_operand.hbm [shape: bf16[32,128], index: 1, kind: input, shape index: {}]   ;;  %s727_s2 = inlined_call_operand.vmem [shape: f32[1,128], index: 2, kind: input, shape index: {}]   ;;  %s728_s3 = inlined_call_operand.hbm [shape: bf16[128,128], index: 3, kind: input, shape index: {}]   ;;  %s729_s4 = inlined_call_operand.vmem [shape: f32[1,128], index: 4, kind: input, shape index: {}]   ;;  %s730_s5 = inlined_call_operand.hbm [shape: bf16[128,128], index: 5, kind: input, shape index: {}]   ;;  %s731_s6 = inlined_call_operand.vmem [shape: f32[1,128], index: 6, kind: input, shape index: {}]   ;;  %s732_s7 = inlined_call_operand.hbm [shape: f32[8,128], index: 7, kind: output, shape index: {}]  }
   0x1   :  { %13 = vsyncpa [#allocation6], 0 }
   0x2   :  { %14 = vsyncpa [#allocation9], 0 }
   0x3   :  { %15 = vsyncpa [#allocation4], 0  ;;  %s619_s24 = smov [#allocation5]  }
   0x4   :  { %s31_s25 = sshll.u32 %s619_s24, 4  ;;  %s32_s25 = int_to_ptr.vmem [resolvable:$true] %s31_s25 }
   0x5   :  { %s519_s26 = scalar_lea.vmem %s32_s25, 256  ;;  %p524_p1 = scmp.lt.s32.totalorder %s32_s25, %s32_s25 }
   0x6   :  { %p520_p0 = scmp.ne.s32.totalorder %s32_s25, %s519_s26  ;;  %p525_p2 = scmp.lt.s32.totalorder %s519_s26, %s519_s26 }
   0x8   :  { %p526_p3 = por %p525_p2, %p524_p1 }
   0xa   :  { %p527_p4 = pnand %p526_p3, %p520_p0 }
   0xc   :  { %530 = shalt.err (!%p527_p4)
}
   0xd   :  { %s620_s27 = smov 64   ;;  %s621_s28 = smov 4  }
   0xe   :  { %37 = dma.hbm_to_vmem [thread:$0]  %s726_s1, 256, %s32_s25, [#allocation6], %s620_s27, %s620_s27, %s621_s28  }
   0xf   :  { %s622_s8 = smov [#allocation2]   ;;  %s623_s10 = smov [#allocation7]  }
  0x10   :  { %s22_s9 = sshll.u32 %s622_s8, 4  ;;  %s45_s11 = sshll.u32 %s623_s10, 4  ;;  %s23_s9 = int_to_ptr.vmem [resolvable:$true] %s22_s9  ;;  %s46_s11 = int_to_ptr.vmem [resolvable:$true] %s45_s11 }
  0x11   :  { %s539_s12 = scalar_lea.vmem %s23_s9, 64  ;;  %p544_p6 = scmp.lt.s32.totalorder %s23_s9, %s23_s9 }
  0x12   :  { %p540_p5 = scmp.ne.s32.totalorder %s23_s9, %s539_s12  ;;  %p545_p7 = scmp.lt.s32.totalorder %s539_s12, %s539_s12 }
  0x14   :  { %p546_p8 = por %p545_p7, %p544_p6 }
  0x16   :  { %p547_p9 = pnand %p546_p8, %p540_p5 }
  0x18   :  { %550 = shalt.err (!%p547_p9)
}
  0x19   :  { %25 = dma.hbm_to_vmem [thread:$0]  %s725_s0, 64, %s23_s9, [#allocation3]  }
  0x1a   :  { %s559_s15 = scalar_lea.vmem %s46_s11, 1024  ;;  %p564_p11 = scmp.lt.s32.totalorder %s46_s11, %s46_s11 }
  0x1b   :  { %p560_p10 = scmp.ne.s32.totalorder %s46_s11, %s559_s15  ;;  %p565_p12 = scmp.lt.s32.totalorder %s559_s15, %s559_s15 }
  0x1d   :  { %p566_p13 = por %p565_p12, %p564_p11 }
  0x1f   :  { %p567_p0 = pnand %p566_p13, %p560_p10 }
  0x21   :  { %570 = shalt.err (!%p567_p0)
}
  0x22   :  { %51 = dma.hbm_to_vmem [thread:$0]  %s728_s3, 1024, %s46_s11, [#allocation6], %s620_s27, %s620_s27, %s621_s28  }
  0x23   :  { %s624_s17 = smov [#allocation8]  }
  0x24   :  { %s59_s18 = sshll.u32 %s624_s17, 4  ;;  %s60_s18 = int_to_ptr.vmem [resolvable:$true] %s59_s18 }
  0x25   :  { %s579_s19 = scalar_lea.vmem %s60_s18, 1024  ;;  %p584_p2 = scmp.lt.s32.totalorder %s60_s18, %s60_s18 }
  0x26   :  { %p580_p1 = scmp.ne.s32.totalorder %s60_s18, %s579_s19  ;;  %p585_p3 = scmp.lt.s32.totalorder %s579_s19, %s579_s19 }
  0x28   :  { %p586_p4 = por %p585_p3, %p584_p2 }
  0x2a   :  { %p587_p5 = pnand %p586_p4, %p580_p1 }
  0x2c   :  { %590 = shalt.err (!%p587_p5)
}
  0x2d   :  { %65 = dma.hbm_to_vmem [thread:$0]  %s730_s5, 1024, %s60_s18, [#allocation9], %s620_s27, %s620_s27, %s621_s28  }
  0x2e   :  { %611 = dma.done.wait [#allocation3], 64  }
  0x2f   :  { %612 = vsyncadd [#allocation3], 4294967232 }
  0x30   :  { %613 = dma.done.wait [#allocation6], 1280  }
  0x31   :  { %614 = vsyncadd [#allocation6], 4294966016 }
  0x32   :  { %615 = dma.done.wait [#allocation9], 1024  }
  0x33   :  { %616 = vsyncadd [#allocation9], 4294966272  ;;  %v625_v0 = vmov 0.0   ;;  %vm626_vm0 = vmmov 0   ;;  %v493_v1 = vld [vmem:[#allocation5 + $0x8] sm:$0xff]   ;;  %v494_v2 = vld [vmem:[#allocation5] sm:$0xff]  }
  0x34   :  { %436 = vmatprep.subr.bf16.mxu0 %v625_v0  ;;  %440 = vmatprep.mubr.msk.bf16.mxu0 %vm626_vm0, %v625_v0  ;;  %v495_v3 = vld [vmem:[#allocation7 + $0x38] sm:$0xff]   ;;  %vm105_vm1 = vcmask 261120   ;;  %v496_v4 = vld [vmem:[#allocation7 + $0x30] sm:$0xff]   ;;  %v81_v5 = vld [vmem:[#allocation2] sm:$0xf]  ;;  %s627_s24 = smov [#allocation10]  }
  0x35   :  { %444 = vmatprep.subr.bf16.mxu1 %v625_v0  ;;  %460 = vmatprep.mubr.msk.bf16.mxu1 %vm626_vm0, %v625_v0  ;;  %v497_v6 = vld [vmem:[#allocation7 + $0x28] sm:$0xff]   ;;  %v498_v7 = vld [vmem:[#allocation7 + $0x20] sm:$0xff]   ;;  %v499_v8 = vld [vmem:[#allocation7 + $0x18] sm:$0xff]   ;;  %s382_s25 = sshll.u32 %s627_s24, 4  ;;  %s383_s25 = int_to_ptr.vmem [resolvable:$true] %s382_s25 }
  0x36   :  { %437 = vmatpush3.bf16.msra.mxu0 %v493_v1  ;;  %445 = vmatpush3.bf16.msra.mxu1 %v495_v3  ;;  %v500_v9 = vld [vmem:[#allocation7 + $0x10] sm:$0xff]   ;;  %v501_v10 = vld [vmem:[#allocation7 + $0x8] sm:$0xff]   ;;  %v502_v11 = vld [vmem:[#allocation7] sm:$0xff]   ;;  %p596_p7 = scmp.lt.s32.totalorder %s383_s25, %s383_s25 }
  0x37   :  { %438 = vmatprep.subr.bf16.mxu0 %v625_v0  ;;  %446 = vmatprep.subr.bf16.mxu1 %v625_v0  ;;  %v503_v12 = vld [vmem:[#allocation8 + $0x38] sm:$0xff]   ;;  %v504_v13 = vld [vmem:[#allocation8 + $0x30] sm:$0xff]   ;;  %v505_v14 = vld [vmem:[#allocation8 + $0x28] sm:$0xff]  }
  0x38   :  { %v506_v15 = vld [vmem:[#allocation8 + $0x20] sm:$0xff]   ;;  %v507_v16 = vld [vmem:[#allocation8 + $0x18] sm:$0xff]   ;;  %v508_v17 = vld [vmem:[#allocation8 + $0x10] sm:$0xff]  }
  0x39   :  { %v393_v18 = vld [vmem:[%s727_s2] ss:$0 sm:$0xff]  ;;  %v510_v27 = vld [vmem:[#allocation8] sm:$0xff]  }
  0x3a   :  { %439 = vmatpush3.bf16.msra.mxu0 %v494_v2  ;;  %447 = vmatpush3.bf16.msra.mxu1 %v496_v4  ;;  %v509_v26 = vld [vmem:[#allocation8 + $0x8] sm:$0xff]  }
  0x3b   :  { %464 = vmatprep.subr.bf16.mxu0 %v625_v0  ;;  %448 = vmatprep.subr.bf16.mxu1 %v625_v0  ;;  %v397_v28 = vld [vmem:[%s729_s4] ss:$0 sm:$0xff]  ;;  %s591_s4 = scalar_lea.vmem %s383_s25, 128 }
  0x3c   :  { %v406_v36 = vld [vmem:[%s731_s6] ss:$0 sm:$0xff]  ;;  %p592_p6 = scmp.ne.s32.totalorder %s383_s25, %s591_s4  ;;  %p597_p8 = scmp.lt.s32.totalorder %s591_s4, %s591_s4 }
  0x3d   :  { %441 = vmatmul.mubr.msk.bf16.vlgmr.msra.gmra.mxu0 %vm105_vm1, %v81_v5 }
  0x3e   :  { %480 = vmatprep.mubr.msk.bf16.mxu0 %vm626_vm0, %v625_v0  ;;  %449 = vmatpush3.bf16.msra.mxu1 %v497_v6  ;;  %p598_p9 = por %p597_p8, %p596_p7 }
  0x3f   :  { %450 = vmatprep.subr.bf16.mxu1 %v625_v0  ;;  %465 = vmatpush3.bf16.msra.mxu0 %v503_v12 }
  0x40   :  { %466 = vmatprep.subr.bf16.mxu0 %v625_v0  ;;  %p599_p10 = pnand %p598_p9, %p592_p6 }
  0x42   :  { %451 = vmatpush3.bf16.msra.mxu1 %v498_v7 }
  0x43   :  { %452 = vmatprep.subr.bf16.mxu1 %v625_v0  ;;  %467 = vmatpush3.bf16.msra.mxu0 %v504_v13 }
  0x44   :  { %468 = vmatprep.subr.bf16.mxu0 %v625_v0 }
  0x46   :  { %453 = vmatpush3.bf16.msra.mxu1 %v499_v8 }
  0x47   :  { %454 = vmatprep.subr.bf16.mxu1 %v625_v0  ;;  %469 = vmatpush3.bf16.msra.mxu0 %v505_v14 }
  0x48   :  { %470 = vmatprep.subr.bf16.mxu0 %v625_v0 }
  0x4a   :  { %455 = vmatpush3.bf16.msra.mxu1 %v500_v9 }
  0x4b   :  { %456 = vmatprep.subr.bf16.mxu1 %v625_v0  ;;  %471 = vmatpush3.bf16.msra.mxu0 %v506_v15 }
  0x4c   :  { %472 = vmatprep.subr.bf16.mxu0 %v625_v0 }
  0x4e   :  { %457 = vmatpush3.bf16.msra.mxu1 %v501_v10 }
  0x4f   :  { %458 = vmatprep.subr.bf16.mxu1 %v625_v0  ;;  %473 = vmatpush3.bf16.msra.mxu0 %v507_v16 }
  0x50   :  { %474 = vmatprep.subr.bf16.mxu0 %v625_v0 }
  0x52   :  { %459 = vmatpush3.bf16.msra.mxu1 %v502_v11 }
  0x53   :  { %475 = vmatpush3.bf16.msra.mxu0 %v508_v17 }
  0x54   :  { %476 = vmatprep.subr.bf16.mxu0 %v625_v0 }
  0x57   :  { %477 = vmatpush3.bf16.msra.mxu0 %v509_v26 }
  0x58   :  { %478 = vmatprep.subr.bf16.mxu0 %v625_v0 }
  0x5b   :  { %479 = vmatpush3.bf16.msra.mxu0 %v510_v27 }
  0xfd   :  { %v143_v19 = vpop.f32.mrf.mxu0 }
  0xfe   :  { %v144_v20 = vadd.f32 %v393_v18, %v143_v19 }
  0xff   :  { %v442_v21 = vpop.f32.mrf.mxu0 }
 0x100   :  { %v149_v22 = vmax.f32 %v144_v20, 0.0 }
 0x101   :  { %v146_v23 = vpop.f32.mrf.mxu0 }
 0x102   :  { %v150_v24 = vpack.c.bf16 %v149_v22, %v149_v22 }
 0x103   :  { %v443_v25 = vpop.f32.mrf.mxu0 }
 0x104   :  { %461 = vmatmul.mubr.bf16.vlgmr.msra.gmra.mxu1 %v150_v24 }
 0x1c4   :  { %v256_v29 = vpop.f32.mrf.mxu1 }
 0x1c5   :  { %v257_v30 = vadd.f32 %v397_v28, %v256_v29 }
 0x1c6   :  { %v462_v31 = vpop.f32.mrf.mxu1 }
 0x1c7   :  { %v262_v32 = vmax.f32 %v257_v30, 0.0 }
 0x1c8   :  { %v259_v33 = vpop.f32.mrf.mxu1 }
 0x1c9   :  { %v263_v34 = vpack.c.bf16 %v262_v32, %v262_v32 }
 0x1ca   :  { %v463_v35 = vpop.f32.mrf.mxu1 }
 0x1cb   :  { %481 = vmatmul.mubr.bf16.vlgmr.msra.gmra.mxu0 %v263_v34 }
 0x28b   :  { %v369_v37 = vpop.f32.mrf.mxu0 }
 0x28c   :  { %v370_v38 = vadd.f32 %v406_v36, %v369_v37 }
 0x28d   :  { %v482_v39 = vpop.f32.mrf.mxu0 }
 0x28e   :  { %375 = vst [vmem:[#allocation10] sm:$0xff] %v370_v38 }
 0x28f   :  { %v372_v40 = vpop.f32.mrf.mxu0 }
 0x290   :  { %602 = shalt.err (!%p599_p10)
}
 0x291   :  { %385 = dma.vmem_to_hbm [thread:$0]  %s383_s25, 128, %s732_s7, [#allocation4]   ;;  %v483_v41 = vpop.f32.mrf.mxu0 }
 0x292   :  { %617 = dma.done.wait [#allocation4], 128  }
 0x293   :  { %618 = vsyncadd [#allocation4], 4294967168 }
 0x294   :  { %389 = vsyncpa [#allocation3], 1 }
 0x295   :  { %390 = vsyncpa [#allocation6], 1 }
 0x296   :  { %391 = vsyncpa [#allocation9], 1 }
 0x297   :  { %392 = vsyncpa [#allocation4], 1 }

</bundles_post_ra>
